<compile_context>
chip_gen: v7x
topology: tpu7x:2x2x1
jax: 0.10.0
libtpu: 0.0.40
codegen_flags: <defaults>
</compile_context>

<pallas_src>
import jax
import jax.numpy as jnp
from jax.experimental import pallas as pl
from jax.experimental.pallas import tpu as pltpu


def _round_up(x, m):
    return ((x + m - 1) // m) * m


def sem_level_gat_kernel(adj_ref, h_ref, w_ref, out_ref, acc_ref):
    k = pl.program_id(1)

    @pl.when(k == 0)
    def _():
        acc_ref[...] = jnp.zeros_like(acc_ref)

    # h_agg accumulation: acc += A[i_blk, k_blk] @ h[k_blk, :]   (bf16 MXU, f32 acc)
    acc_ref[...] += jnp.dot(adj_ref[...], h_ref[...],
                            preferred_element_type=jnp.float32)

    @pl.when(k == pl.num_programs(1) - 1)
    def _():
        # z_final = h_agg @ W_lin.T  (bf16 MXU operands, f32 accumulation)
        out_ref[...] = jnp.dot(acc_ref[...].astype(jnp.bfloat16), w_ref[...],
                               preferred_element_type=jnp.float32
                               ).astype(out_ref.dtype)


def sem_level_gat(adj, h, w_lin, *, blk_n=256, blk_k=256):
    """SemLevelGAT forward.

    adj   [N, N] dense dst x src adjacency (A[n, m] = #edges m -> n)
    h     [N, D] node features ('z_node_lv')
    w_lin [O, D] linear.weight of Linear(D, O, bias=False)
    returns [N, O] 'z_final'
    """
    n, d = h.shape
    o = w_lin.shape[0]

    # Pad everything to MXU / lane-friendly shapes.  Zero padding is exact here:
    # zero adjacency rows/cols and zero feature/weight rows/cols contribute nothing.
    n_rows = _round_up(n, blk_n)
    n_cols = _round_up(n, blk_k)
    dp = _round_up(d, 128)
    op = _round_up(o, 128)

    adj_p = jnp.zeros((n_rows, n_cols), jnp.bfloat16).at[:n, :n].set(
        adj.astype(jnp.bfloat16))
    h_p = jnp.zeros((n_cols, dp), jnp.bfloat16).at[:n, :d].set(
        h.astype(jnp.bfloat16))
    w_t_p = jnp.zeros((dp, op), jnp.bfloat16).at[:d, :o].set(
        w_lin.T.astype(jnp.bfloat16))

    grid = (n_rows // blk_n, n_cols // blk_k)

    cost = pl.CostEstimate(
        flops=2 * n_rows * n_cols * dp + 2 * n_rows * dp * op,
        transcendentals=0,
        bytes_accessed=(adj_p.size * 2 + h_p.size * 2 + w_t_p.size * 2
                        + n_rows * op * 4),
    )

    out_p = pl.pallas_call(
        sem_level_gat_kernel,
        out_shape=jax.ShapeDtypeStruct((n_rows, op), jnp.float32),
        grid_spec=pltpu.PrefetchScalarGridSpec(
            num_scalar_prefetch=0,
            grid=grid,
            in_specs=[
                pl.BlockSpec((blk_n, blk_k), lambda i, k: (i, k)),  # A tile
                pl.BlockSpec((blk_k, dp), lambda i, k: (k, 0)),     # h tile
                pl.BlockSpec((dp, op), lambda i, k: (0, 0)),        # W_lin.T (resident)
            ],
            out_specs=pl.BlockSpec((blk_n, op), lambda i, k: (i, 0)),
            scratch_shapes=[pltpu.VMEM((blk_n, dp), jnp.float32)],
        ),
        compiler_params=pltpu.CompilerParams(
            dimension_semantics=("parallel", "arbitrary"),
            vmem_limit_bytes=32 * 1024 * 1024,
        ),
        cost_estimate=cost,
    )(adj_p, h_p, w_t_p)

    return out_p[:n, :o]


def sem_level_gat_ref(h, adj, dst, edge_types, w_attn, w_lin):
    """Full-fidelity plain-JAX reference of the PyTorch module (including the
    numerically dead attention/softmax branch).  The two matmuls mirror the
    kernel's bf16-operand / f32-accumulate MXU dtype so the comparison is
    apples-to-apples."""
    n = h.shape[0]
    a = jnp.tanh(edge_types @ w_attn.T)                          # [E, 1]
    sum_tanh = jnp.zeros((n, 1), jnp.float32).at[dst].add(a)     # [N, 1]
    beta = jax.nn.softmax(sum_tanh / n, axis=1)                  # [N, 1] == 1.0 exactly
    adj_b = adj.astype(jnp.bfloat16)
    h_b = h.astype(jnp.bfloat16)
    h_agg = beta * jnp.dot(adj_b, h_b, preferred_element_type=jnp.float32)   # [N, D]
    return jnp.dot(h_agg.astype(jnp.bfloat16), w_lin.T.astype(jnp.bfloat16),
                   preferred_element_type=jnp.float32)           # [N, O]


if __name__ == "__main__":
    # Small deterministic problem, MXU-friendly dims: N nodes, edge-type dim T,
    # node-feature dim D, output dim O.
    N, T, D, O = 512, 8, 128, 128
    key = jax.random.PRNGKey(0)
    k_h, k_attn, k_lin = jax.random.split(key, 3)

    # Node features ('z_node_lv').
    h = jax.random.normal(k_h, (N, D), dtype=jnp.float32)

    # Deterministic graph: node i receives edges from (i+1)%N, (i+3)%N, (i+7)%N.
    src, dst = [], []
    for i in range(N):
        for off in (1, 3, 7):
            src.append((i + off) % N)
            dst.append(i)
    src = jnp.array(src, dtype=jnp.int32)
    dst = jnp.array(dst, dtype=jnp.int32)
    E = src.shape[0]

    # Dense dst x src adjacency (layout glue, plain JAX).
    adj = jnp.zeros((N, N), jnp.float32).at[dst, src].add(1.0)

    # Per-edge type features and module parameters (attention branch is
    # numerically dead; kept only for the reference).
    edge_types = jax.nn.one_hot(jnp.arange(E) % T, T, dtype=jnp.float32)
    w_attn = 0.1 * jax.random.normal(k_attn, (1, T), dtype=jnp.float32)   # attn_fc.weight
    w_lin = 0.1 * jax.random.normal(k_lin, (O, D), dtype=jnp.float32)     # linear.weight

    out = sem_level_gat(adj, h, w_lin)
    out = jax.block_until_ready(out)

    ref = sem_level_gat_ref(h, adj, dst, edge_types, w_attn, w_lin)
    assert out.shape == (N, O)
    # Tolerance covers f32 accumulation-order differences and rare bf16 rounding
    # boundary flips between the kernel and the reference.
    assert jnp.allclose(out, ref, atol=1e-2, rtol=1e-2), "mismatch vs reference"

    print("KERNEL_OK")
</pallas_src>

<mosaic_0001>
module attributes {stable_mosaic.version = 11 : i64} {
  func.func @sem_level_gat_kernel(%arg0: i32, %arg1: i32, %arg2: memref<256x256xbf16, #tpu.memory_space<vmem>>, %arg3: memref<256x128xbf16, #tpu.memory_space<vmem>>, %arg4: memref<128x128xbf16, #tpu.memory_space<vmem>>, %arg5: memref<256x128xf32, #tpu.memory_space<vmem>>, %arg6: memref<256x128xf32, #tpu.memory_space<vmem>>) attributes {dimension_semantics = [#tpu.dimension_semantics<parallel>, #tpu.dimension_semantics<arbitrary>], iteration_bounds = array<i64: 2, 2>, scalar_prefetch = 0 : i64, scratch_operands = 1 : i64, tpu.core_type = #tpu.core_type<tc>, window_params = [{transform_indices = @transform_0, window_bounds = array<i64: 256, 256>}, {transform_indices = @transform_1, window_bounds = array<i64: 256, 128>}, {pipeline_mode = #tpu.pipeline_mode<synchronous>, transform_indices = @transform_2, window_bounds = array<i64: 128, 128>}, {transform_indices = @transform_3, window_bounds = array<i64: 256, 128>}]} {
    %c0_i32 = arith.constant 0 : i32
    %0 = arith.cmpi eq, %arg1, %c0_i32 : i32
    %1 = arith.extui %0 : i1 to i32
    %c0_i32_0 = arith.constant 0 : i32
    %2 = arith.cmpi ne, %1, %c0_i32_0 : i32
    scf.if %2 {
      %cst_9 = arith.constant 0.000000e+00 : f32
      %12 = vector.broadcast %cst_9 : f32 to vector<256x128xf32>
      %c0_10 = arith.constant 0 : index
      %c0_11 = arith.constant 0 : index
      %13 = vector.load %arg6[%c0_10, %c0_11] : memref<256x128xf32, #tpu.memory_space<vmem>>, vector<256x128xf32>
      tpu.vector_store %arg6[%c0_10, %c0_11], %12 {strides = array<i32>} : memref<256x128xf32, #tpu.memory_space<vmem>>, vector<256x128xf32>,
    } else {
    }
    %c0 = arith.constant 0 : index
    %c0_1 = arith.constant 0 : index
    %3 = vector.load %arg6[%c0, %c0_1] : memref<256x128xf32, #tpu.memory_space<vmem>>, vector<256x128xf32>
    %c0_2 = arith.constant 0 : index
    %c0_3 = arith.constant 0 : index
    %4 = vector.load %arg2[%c0_2, %c0_3] : memref<256x256xbf16, #tpu.memory_space<vmem>>, vector<256x256xbf16>
    %c0_4 = arith.constant 0 : index
    %c0_5 = arith.constant 0 : index
    %5 = vector.load %arg3[%c0_4, %c0_5] : memref<256x128xbf16, #tpu.memory_space<vmem>>, vector<256x128xbf16>
    %cst = arith.constant dense<0.000000e+00> : vector<256x128xf32>
    %6 = tpu.matmul %4, %5, %cst {dimension_numbers = #tpu.dot_dimension_numbers<[1], [0], [0], [1], [0, 0, 1, 1], [], []>} : vector<256x256xbf16>, vector<256x128xbf16>, vector<256x128xf32> -> vector<256x128xf32>
    %7 = arith.addf %3, %6 : vector<256x128xf32>
    %c0_6 = arith.constant 0 : index
    %c0_7 = arith.constant 0 : index
    %8 = vector.load %arg6[%c0_6, %c0_7] : memref<256x128xf32, #tpu.memory_space<vmem>>, vector<256x128xf32>
    tpu.vector_store %arg6[%c0_6, %c0_7], %7 {strides = array<i32>} : memref<256x128xf32, #tpu.memory_space<vmem>>, vector<256x128xf32>,
    %c1_i32 = arith.constant 1 : i32
    %9 = arith.cmpi eq, %arg1, %c1_i32 : i32
    %10 = arith.extui %9 : i1 to i32
    %c0_i32_8 = arith.constant 0 : i32
    %11 = arith.cmpi ne, %10, %c0_i32_8 : i32
    scf.if %11 {
      %c0_9 = arith.constant 0 : index
      %c0_10 = arith.constant 0 : index
      %12 = vector.load %arg6[%c0_9, %c0_10] : memref<256x128xf32, #tpu.memory_space<vmem>>, vector<256x128xf32>
      %13 = arith.truncf %12 : vector<256x128xf32> to vector<256x128xbf16>
      %c0_11 = arith.constant 0 : index
      %c0_12 = arith.constant 0 : index
      %14 = vector.load %arg4[%c0_11, %c0_12] : memref<128x128xbf16, #tpu.memory_space<vmem>>, vector<128x128xbf16>
      %cst_13 = arith.constant dense<0.000000e+00> : vector<256x128xf32>
      %15 = tpu.matmul %13, %14, %cst_13 {dimension_numbers = #tpu.dot_dimension_numbers<[1], [0], [0], [1], [0, 0, 1, 1], [], []>} : vector<256x128xbf16>, vector<128x128xbf16>, vector<256x128xf32> -> vector<256x128xf32>
      %c0_14 = arith.constant 0 : index
      %c0_15 = arith.constant 0 : index
      %16 = vector.load %arg5[%c0_14, %c0_15] : memref<256x128xf32, #tpu.memory_space<vmem>>, vector<256x128xf32>
      tpu.vector_store %arg5[%c0_14, %c0_15], %15 {strides = array<i32>} : memref<256x128xf32, #tpu.memory_space<vmem>>, vector<256x128xf32>,
    } else {
    }
    return
  }
  func.func @transform_0(%arg0: i32, %arg1: i32) -> (i32, i32) {
    %c0_i32 = arith.constant 0 : i32
    return %arg0, %arg1 : i32, i32
  }
  func.func @transform_1(%arg0: i32, %arg1: i32) -> (i32, i32) {
    %c0_i32 = arith.constant 0 : i32
    %c0_i32_0 = arith.constant 0 : i32
    return %arg1, %c0_i32 : i32, i32
  }
  func.func @transform_2(%arg0: i32, %arg1: i32) -> (i32, i32) {
    %c0_i32 = arith.constant 0 : i32
    %c0_i32_0 = arith.constant 0 : i32
    %c0_i32_1 = arith.constant 0 : i32
    return %c0_i32, %c0_i32_0 : i32, i32
  }
  func.func @transform_3(%arg0: i32, %arg1: i32) -> (i32, i32) {
    %c0_i32 = arith.constant 0 : i32
    %c0_i32_0 = arith.constant 0 : i32
    return %arg0, %c0_i32 : i32, i32
  }
}

</mosaic_0001>

<bundles_post_ra>
// kernel: tpu_custom_call.1
= control target key start
LH: loop header
LB: loop body
LE: loop exit
PB: predicated region body
PF: predicated region fallthrough
CT: control target
= control target key end

     0   :  { %s2582_s0 = inlined_call_operand.hbm [shape: bf16[512,512], index: 0, kind: input, shape index: {}]   ;;  %s2583_s1 = inlined_call_operand.hbm [shape: bf16[512,128], index: 1, kind: input, shape index: {}]   ;;  %s2584_s2 = inlined_call_operand.hbm [shape: bf16[128,128], index: 2, kind: input, shape index: {}]   ;;  %s2585_s3 = inlined_call_operand.hbm [shape: f32[512,128], index: 3, kind: output, shape index: {}]  }
   0x1   :  { %2608 = sst [smem:[#allocation24_spill]] %s2584_s2 }
   0x2   :  { %2609 = sst [smem:[#allocation25_spill]] %s2585_s3 }
   0x3   :  { %8 = vsyncpa [#allocation4], 0 }
   0x4   :  { %10 = vsyncpa [#allocation4 + $0x1], 0 }
   0x5   :  { %11 = vsyncpa [#allocation7], 0 }
   0x6   :  { %13 = vsyncpa [#allocation7 + $0x1], 0 }
   0x7   :  { %14 = vsyncpa [#allocation5], 0 }
   0x8   :  { %16 = vsyncpa [#allocation5 + $0x1], 0  ;;  %s2118_s12 = smov 0   ;;  %s2120_s13 = smov 0  }
   0x9   :  { %s2122_s14 = smov 0   ;;  %s2124_s15 = smov 0  }
   0xa   :  { %s2126_s16 = smov 0   ;;  %s2128_s17 = smov 0  }
   0xb   :  { %s2130_s18 = smov 0   ;;  %s2132_s19 = smov 0  }
   0xc   :  { %s2134_s20 = smov 0   ;;  %s2136_s21 = smov 0  }
   0xd   :  { %s2138_s22 = smov 0   ;;  %s2140_s23 = smov 0  }
   0xe   :  { %s2142_s24 = smov 0   ;;  %s2144_s25 = smov 0  }
   0xf LB: > { %2610 = sst [smem:[#allocation14_spill]] %s2032_s12  ;;  %s2185_s26 = sadd.s32 4294967295, %s2084_s25   ;;  %s2084_s25 = sphi %s2144_s25, %s22_s25   ;;  %s2080_s24 = sphi %s2142_s24, %s2670_s24   ;;  %s2076_s23 = sphi %s2140_s23, %s2669_s23   ;;  %s2072_s22 = sphi %s2138_s22, %s2668_s22   ;;  %s2068_s21 = sphi %s2136_s21, %s2667_s21   ;;  %s2064_s20 = sphi %s2134_s20, %s2666_s20   ;;  %s2060_s19 = sphi %s2132_s19, %s2665_s19   ;;  %s2056_s18 = sphi %s2130_s18, %s2664_s18   ;;  %s2052_s17 = sphi %s2128_s17, %s2663_s17   ;;  %s2048_s16 = sphi %s2126_s16, %s2662_s16   ;;  %s2044_s15 = sphi %s2124_s15, %s2661_s15   ;;  %s2040_s14 = sphi %s2122_s14, %s2660_s14   ;;  %s2036_s13 = sphi %s2120_s13, %s2659_s13   ;;  %s2032_s12 = sphi %s2118_s12, %s2658_s12  }
  0x10   : > { %2611 = sst [smem:[#allocation15_spill]] %s2036_s13  ;;  %s1321_s27 = sadd.s32 4294967294, %s2084_s25  }
  0x11   : > { %2612 = sst [smem:[#allocation16_spill]] %s2068_s21  ;;  %p56_p0 = scmp.ne.s32.totalorder %s2060_s19, %s2056_s18 }
  0x12   : > { %2613 = sst [smem:[#allocation17_spill]] %s2072_s22  ;;  %p2587_p1 = scmp.eq.s32.totalorder %s2185_s26, 0 }
  0x13   : > { %2614 = sst [smem:[#allocation18_spill]] %s2185_s26  ;;  %p82_p2 = scmp.ne.s32.totalorder %s2048_s16, %s2044_s15 }
  0x14   : > { %p2194_p3 = por %p2587_p1, %p56_p0  ;;  %p126_p4 = scmp.ne.s32.totalorder %s2040_s14, %s2036_s13 }
  0x15   : > { %p2202_p5 = por %p82_p2, %p2587_p1  ;;  %p127_p6 = scmp.eq.s32.totalorder %s2185_s26, 3 }
  0x16   : > { %s2615_s29 = scalar_select %p2194_p3, 1, 0 }
  0x17   : > { %s2616_s30 = scalar_select %p2202_p5, 1, 0 }
  0x18   : > { %p132_p7 = scmp.ne.s32.totalorder %s2036_s13, %s2032_s12  ;;  %p133_p8 = scmp.eq.s32.totalorder %s1321_s27, 3 }
  0x19   : > { %2617 = sst [smem:[#allocation19_spill]] %s2616_s30  ;;  %p2209_p9 = por %p127_p6, %p126_p4 }
  0x1a   : > { %p1322_p10 = scmp.ge.s32.totalorder %s2084_s25, 1  ;;  %p2214_p11 = por %p133_p8, %p132_p7 }
  0x1b   : > { %s2618_s4 = scalar_select %p2209_p9, 1, 0 }
  0x1c   : > { %s2620_s5 = scalar_select %p2214_p11, 1, 0 }
  0x1d   : > { %2619 = sst [smem:[#allocation20_spill]] %s2618_s4  ;;  %p140_p12 = scmp.lt.s32.totalorder %s2084_s25, 5 }
  0x1e   : > { %2621 = sst [smem:[#allocation21_spill]] %s2620_s5  ;;  %s2086_s7 = smov [#allocation8]  }
  0x1f   : > { %p2219_p13 = pnand %p1322_p10, %p140_p12  ;;  %s152_s8 = sshll.u32 %s2086_s7, 4  ;;  %s153_s8 = int_to_ptr.vmem [resolvable:$true] %s152_s8 }
  0x20   : > { %s2624_s2 = sld [smem:[#allocation24_spill]] }
  0x21   : > { %s2622_s6 = scalar_select %p2219_p13, 1, 0 }
  0x22   : > { %p1630_p0 = pneg %p2219_p13 }
  0x24   : > { %p2227_p2 = pnand %p1630_p0, %p2587_p1 }
  0x26   : > { %s1842_s15 = scalar_lea.hbm %s2624_s2, 1024  ;;  %p1844_p6 = pneg %p2227_p2 }
  0x27   : > { %p1843_p4 = scmp.ne.s32.totalorder %s2624_s2, %s1842_s15  ;;  %p1849_p10 = scmp.lt.u32.totalorder %s1842_s15, %s2624_s2 }
  0x29   : > { %p1845_p7 = pnand %p1844_p6, %p1843_p4 }
  0x2b   : > { %p1846_p8 = pneg %p1845_p7 }
  0x2d   : > { %p1851_p12 = pnand %p1849_p10, %p1846_p8 }
  0x2f   : > { %1854 = shalt.err (!%p1851_p12)
}
  0x30   : > { %s1855_s5 = scalar_lea.vmem %s153_s8, 1024  ;;  %p1863_p9 = scmp.lt.s32.totalorder %s153_s8, %s153_s8 }
  0x31   : > { %p1856_p0 = scmp.ne.s32.totalorder %s153_s8, %s1855_s5  ;;  %p1864_p5 = scmp.lt.s32.totalorder %s1855_s5, %s1855_s5 }
  0x33   : > { %p1858_p1 = pnand %p1856_p0, %p1844_p6  ;;  %p1865_p3 = por %p1864_p5, %p1863_p9 }
  0x35   : > { %p1859_p11 = pneg %p1858_p1 }
  0x37   : > { %p1866_p13 = pnand %p1865_p3, %p1859_p11 }
  0x39   : > { %1869 = shalt.err (!%p1866_p13)
}
  0x3a   : > { %s2592_s10 = smov 64   ;;  %s2593_s28 = smov 4  }
  0x3b   : > { %1633 = dma.hbm_to_vmem [thread:$0]  (!%p2227_p2), %s2624_s2, 1024, %s153_s8, [#allocation7], %s2592_s10, %s2592_s10, %s2593_s28  }
  0x3c   : > { %s31_s15 = sadd.s32 1, %s2076_s23  ;;  %s34_s18 = sadd.s32 1, %s2080_s24 }
  0x3d   : > { %p32_p1 = scmp.ge.s32.totalorder %s31_s15, 2  ;;  %s43_s27 = sadd.s32 1, %s2064_s20 }
  0x3e   : > { %p50_p3 = scmp.ne.s32.totalorder %s2064_s20, %s2060_s19  ;;  %p2607_p5 = scmp.eq.s32.totalorder %s2084_s25, 0 }
  0x3f   : > { %s2672_s15 = smov (%p32_p1, %s31_s15), 0  ;;  %s2674_s18 = smov (!%p32_p1, %s34_s18), %s2080_s24 }
  0x40   : > { %2625 = sst [smem:[#allocation22_spill]] %s2672_s15  ;;  %s2260_s9 = ssub.s32 %s2076_s23, %s2672_s15 }
  0x41   : > { %p36_p9 = scmp.ge.s32.totalorder %s2674_s18, 2  ;;  %p67_p11 = scmp.eq.s32.totalorder %s2260_s9, 0 }
  0x42   : > { %p2266_p13 = por %p2607_p5, %p50_p3  ;;  %p2606_p2 = scmp.lt.s32.totalorder %s2084_s25, 4 }
  0x43   : > { %s2676_s18 = smov (%p36_p9, %s2674_s18), 0  ;;  %s166_s7 = sand.u32 1, %s2064_s20  }
  0x44   : > { %2627 = sst [smem:[#allocation23_spill]] %s2676_s18  ;;  %s1327_s5 = sshll.u32 %s2076_s23, 1 }
  0x45   : > { %s38_s11 = ssub.s32 %s2080_s24, %s2676_s18  ;;  %s1325_s28 = sshll.u32 %s166_s7, 8 }
  0x46   : > { %s40_s10 = sor.u32 %s2260_s9, %s38_s11  ;;  %p114_p4 = scmp.eq.s32.totalorder %s38_s11, 0 }
  0x47   : > { %p41_p6 = scmp.eq.s32.totalorder %s40_s10, 0  ;;  %s2628_s2 = sadd.s32 1, %s2040_s14 }
  0x48   : > { %s2281_s15 = scalar_select %p114_p4, %s2040_s14, %s2628_s2  }
  0x49   : > { %s2284_s12 = scalar_select %p41_p6, %s2064_s20, %s43_s27  }
  0x4a   : > { %s1401_s3 = sshll.u32 %s2080_s24, 7  ;;  %s170_s22 = scalar_lea.vmem [#allocation3], %s1325_s28 }
  0x4b   : > { %s177_s4 = sadd.s32 %s1401_s3, %s1327_s5  ;;  %s180_s21 = sshll.u32 %s170_s22, 4  ;;  %s2287_s21 = int_to_ptr.vmem [resolvable:$true] %s180_s21 }
  0x4c   : > { %s1329_s13 = sshll.u32 %s177_s4, 6  ;;  %p2298_p7 = pnand %p2606_p2, %p2266_p13 }
  0x4d   : > { %s2292_s18 = scalar_lea.hbm %s2582_s0, %s1329_s13  ;;  %s2302_s3 = scalar_lea.sflag [#allocation4], %s166_s7 }
  0x4e   : > { %s1870_s22 = scalar_lea.hbm %s2292_s18, 4096  ;;  %p1872_p10 = pneg %p2298_p7 }
  0x4f   : > { %p1871_p8 = scmp.ne.s32.totalorder %s2292_s18, %s1870_s22  ;;  %s1875_s30 = scalar_lea.hbm %s2582_s0, 16384 }
  0x50   : > { %p1876_p1 = scmp.lt.u32.totalorder %s2292_s18, %s2582_s0  ;;  %p1877_p3 = scmp.lt.u32.totalorder %s1875_s30, %s1870_s22 }
  0x51   : > { %p1873_p12 = pnand %p1872_p10, %p1871_p8  ;;  %p1879_p13 = scmp.lt.u32.totalorder %s1870_s22, %s2292_s18 }
  0x52   : > { %p1878_p9 = por %p1877_p3, %p1876_p1 }
  0x53   : > { %p1874_p0 = pneg %p1873_p12 }
  0x54   : > { %p1880_p4 = por %p1879_p13, %p1878_p9 }
  0x56   : > { %p1881_p6 = pnand %p1880_p4, %p1874_p0 }
  0x58   : > { %1884 = shalt.err (!%p1881_p6)
}
  0x59   : > { %s1885_s28 = scalar_lea.vmem %s2287_s21, 4096  ;;  %s2089_s27 = smov [#allocation3]  }
  0x5a   : > { %p1886_p8 = scmp.ne.s32.totalorder %s2287_s21, %s1885_s28  ;;  %s1890_s8 = sshll.u32 %s2089_s27, 4  ;;  %s1891_s8 = int_to_ptr.vmem [resolvable:$false] %s1890_s8 }
  0x5b   : > { %s1892_s7 = scalar_lea.vmem %s1891_s8, 8192  ;;  %p1893_p5 = scmp.lt.s32.totalorder %s2287_s21, %s1891_s8 }
  0x5c   : > { %p1888_p12 = pnand %p1886_p8, %p1872_p10  ;;  %p1894_p1 = scmp.lt.s32.totalorder %s1892_s7, %s1885_s28 }
  0x5e   : > { %p1889_p2 = pneg %p1888_p12  ;;  %p1895_p3 = por %p1894_p1, %p1893_p5 }
  0x60   : > { %p1896_p9 = pnand %p1895_p3, %p1889_p2 }
  0x62   : > { %1899 = shalt.err (!%p1896_p9)
}
  0x63   : > { %s2090_s5 = smov 256   ;;  %s2091_s11 = smov 128  }
  0x64   : > { %s2092_s22 = smov 8   ;;  %s190_s13 = sand.u32 1, %s2084_s25  }
  0x65   : > { %1637 = dma.hbm_to_vmem [thread:$0]  (!%p2298_p7), %s2292_s18, 4096, %s2287_s21, %s2302_s3, %s2090_s5, %s2091_s11, %s2092_s22  }
  0x66   : > { %s69_s26 = sadd.s32 1, %s2052_s17  ;;  %p76_p5 = scmp.ne.s32.totalorder %s2052_s17, %s2048_s16 }
  0x67   : > { %s2337_s30 = scalar_select %p67_p11, %s2052_s17, %s69_s26  }
  0x68   : > { %p2630_p2 = scmp.eq.s32.totalorder %s2084_s25, 0  ;;  %s192_s4 = sand.u32 1, %s2052_s17  }
  0x69   : > { %s1330_s10 = sshll.u32 %s192_s4, 7  ;;  %s1402_s28 = sshll.u32 %s2076_s23, 11 }
  0x6a   : > { %p78_p10 = por %p76_p5, %p2630_p2  ;;  %s2346_s7 = scalar_lea.hbm %s2583_s1, %s1402_s28 }
  0x6b   : > { %s194_s21 = scalar_lea.vmem [#allocation6], %s1330_s10  ;;  %p2631_p7 = scmp.lt.s32.totalorder %s2084_s25, 4 }
  0x6c   : > { %s201_s18 = sshll.u32 %s194_s21, 4  ;;  %s2356_s2 = scalar_lea.sflag [#allocation7], %s190_s13  ;;  %s2354_s18 = int_to_ptr.vmem [resolvable:$true] %s201_s18 }
  0x6d   : > { %p2350_p0 = pnand %p2631_p7, %p78_p10  ;;  %s1900_s3 = scalar_lea.hbm %s2346_s7, 2048 }
  0x6e   : > { %p1901_p11 = scmp.ne.s32.totalorder %s2346_s7, %s1900_s3  ;;  %s1905_s22 = scalar_lea.hbm %s2583_s1, 4096 }
  0x6f   : > { %p1902_p13 = pneg %p2350_p0  ;;  %p1906_p8 = scmp.lt.u32.totalorder %s2346_s7, %s2583_s1 }
  0x70   : > { %p1907_p12 = scmp.lt.u32.totalorder %s1905_s22, %s1900_s3  ;;  %p1909_p3 = scmp.lt.u32.totalorder %s1900_s3, %s2346_s7 }
  0x71   : > { %p1903_p4 = pnand %p1902_p13, %p1901_p11 }
  0x72   : > { %p1908_p1 = por %p1907_p12, %p1906_p8 }
  0x73   : > { %p1904_p6 = pneg %p1903_p4 }
  0x74   : > { %p1910_p9 = por %p1909_p3, %p1908_p1 }
  0x76   : > { %p1911_p5 = pnand %p1910_p9, %p1904_p6 }
  0x78   : > { %1914 = shalt.err (!%p1911_p5)
}
  0x79   : > { %s1915_s13 = scalar_lea.vmem %s2354_s18, 2048  ;;  %s2093_s10 = smov [#allocation6]  }
  0x7a   : > { %p1916_p2 = scmp.ne.s32.totalorder %s2354_s18, %s1915_s13  ;;  %s1920_s28 = sshll.u32 %s2093_s10, 4  ;;  %s1921_s28 = int_to_ptr.vmem [resolvable:$false] %s1920_s28 }
  0x7b   : > { %s1922_s27 = scalar_lea.vmem %s1921_s28, 4096  ;;  %p1923_p11 = scmp.lt.s32.totalorder %s2354_s18, %s1921_s28 }
  0x7c   : > { %p1918_p10 = pnand %p1916_p2, %p1902_p13  ;;  %p1924_p4 = scmp.lt.s32.totalorder %s1922_s27, %s1915_s13 }
  0x7e   : > { %p1919_p7 = pneg %p1918_p10  ;;  %p1925_p8 = por %p1924_p4, %p1923_p11 }
  0x80   : > { %p1926_p12 = pnand %p1925_p8, %p1919_p7 }
  0x82   : > { %1929 = shalt.err (!%p1926_p12)
}
  0x83   : > { %s2633_s8 = smov 4   ;;  %s2634_s21 = smov 64  }
  0x84   : > { %1640 = dma.hbm_to_vmem [thread:$0]  (!%p2350_p0), %s2346_s7, 2048, %s2354_s18, %s2356_s2, %s2634_s21, %s2634_s21, %s2633_s8  }
  0x85   : > { %p2635_p13 = scmp.ne.s32.totalorder %s2622_s6, 0 }
  0x86   : > { %s215_s3 = sand.u32 (!%p2635_p13), 1, %s2060_s19   ;;  %p2636_p6 = scmp.ne.s32.totalorder (!%p2635_p13), %s2615_s29, 0 }
  0x87   : > { %213 = sbr.rel (%p2635_p13) target bundleno = 763 (0x2fb), region = 32  ;;  %s1334_s5 = sshll.u32 (!%p2635_p13), %s215_s3, 8 }
  0x88   : > { %s216_s11 = scalar_lea.sflag (!%p2635_p13), [#allocation4], %s215_s3  ;;  %s2390_s22 = scalar_lea.vmem (!%p2635_p13), [#allocation3], %s1334_s5 }
  0x8e   : > { %2015 = dma.done.wait (%p2636_p6), %s216_s11, 4096  }
  0x8f   : > { %2017 = vsyncadd (%p2636_p6), %s216_s11, 4294963200  ;;  %s2637_s9 = sld [smem:[#allocation18_spill]]  ;;  %s2638_s26 = sld [smem:[#allocation19_spill]] }
  0x90   : > { %s226_s7 = sand.u32 1, %s2048_s16  }
  0x91   : > { %s1335_s18 = sshll.u32 %s226_s7, 7 }
  0x92   : > { %s2398_s2 = scalar_lea.vmem [#allocation6], %s1335_s18 }
  0x95   : > { %s224_s4 = sand.u32 1, %s2637_s9   ;;  %p2639_p0 = scmp.ne.s32.totalorder %s2638_s26, 0 }
  0x96   : > { %s225_s6 = scalar_lea.sflag [#allocation7], %s224_s4 }
  0x97   : > { %2019 = dma.done.wait (%p2639_p0), %s225_s6, 2048  }
  0x98   : > { %2021 = vsyncadd (%p2639_p0), %s225_s6, 4294965248  ;;  %p2640_p1 = scmp.eq.s32.totalorder %s2637_s9, 0 }
  0x9a   : > { %2023 = dma.done.wait (%p2640_p1), [#allocation7], 1024   ;;  %p2641_p3 = pmov %p2640_p1 }
  0x9b   : > { %s2642_s29 = sld [smem:[#allocation15_spill]]  ;;  %s2643_s27 = sld [smem:[#allocation16_spill]] }
  0x9c   : > { %2025 = vsyncadd (%p2641_p3), [#allocation7], 4294966272 }
  0xa1   : > { %s257_s13 = sand.u32 1, %s2642_s29   ;;  %p1338_p9 = scmp.ne.s32.totalorder %s2643_s27, 0 }
  0xa2   : > { %s1337_s10 = sshll.u32 %s257_s13, 8  ;;  %v2094_v0 = vmov (!%p1338_p9), 0.0  }
  0xa3   : > { %s2411_s28 = scalar_lea.vmem [#allocation9], %s1337_s10  ;;  %268 = sbr.rel (%p1338_p9) target bundleno = 179 (0xb3), region = 48  ;;  %269 = vst [vmem:[#allocation2] sm:$0xff] (!%p1338_p9), %v2094_v0  ;;  %270 = vst [vmem:[#allocation2 + $0x8] sm:$0xff] (!%p1338_p9), %v2094_v0 }
  0xa4   : > { %271 = vst [vmem:[#allocation2 + $0x10] sm:$0xff] (!%p1338_p9), %v2094_v0  ;;  %272 = vst [vmem:[#allocation2 + $0x18] sm:$0xff] (!%p1338_p9), %v2094_v0 }
  0xa5   : > { %273 = vst [vmem:[#allocation2 + $0x20] sm:$0xff] (!%p1338_p9), %v2094_v0  ;;  %274 = vst [vmem:[#allocation2 + $0x28] sm:$0xff] (!%p1338_p9), %v2094_v0 }
  0xa6   : > { %275 = vst [vmem:[#allocation2 + $0x30] sm:$0xff] (!%p1338_p9), %v2094_v0  ;;  %276 = vst [vmem:[#allocation2 + $0x38] sm:$0xff] (!%p1338_p9), %v2094_v0 }
  0xa7   : > { %277 = vst [vmem:[#allocation2 + $0x40] sm:$0xff] (!%p1338_p9), %v2094_v0  ;;  %278 = vst [vmem:[#allocation2 + $0x48] sm:$0xff] (!%p1338_p9), %v2094_v0 }
  0xa8   : > { %279 = vst [vmem:[#allocation2 + $0x50] sm:$0xff] (!%p1338_p9), %v2094_v0  ;;  %280 = vst [vmem:[#allocation2 + $0x58] sm:$0xff] (!%p1338_p9), %v2094_v0 }
  0xa9   : > { %281 = vst [vmem:[#allocation2 + $0x60] sm:$0xff] (!%p1338_p9), %v2094_v0  ;;  %282 = vst [vmem:[#allocation2 + $0x68] sm:$0xff] (!%p1338_p9), %v2094_v0 }
  0xaa   : > { %283 = vst [vmem:[#allocation2 + $0x70] sm:$0xff] %v2094_v0  ;;  %284 = vst [vmem:[#allocation2 + $0x78] sm:$0xff] %v2094_v0 }
  0xab   : > { %285 = vst [vmem:[#allocation2 + $0x80] sm:$0xff] %v2094_v0  ;;  %286 = vst [vmem:[#allocation2 + $0x88] sm:$0xff] %v2094_v0 }
  0xac   : > { %287 = vst [vmem:[#allocation2 + $0x90] sm:$0xff] %v2094_v0  ;;  %288 = vst [vmem:[#allocation2 + $0x98] sm:$0xff] %v2094_v0 }
  0xad   : > { %289 = vst [vmem:[#allocation2 + $0xa0] sm:$0xff] %v2094_v0  ;;  %290 = vst [vmem:[#allocation2 + $0xa8] sm:$0xff] %v2094_v0 }
  0xae   : > { %291 = vst [vmem:[#allocation2 + $0xb0] sm:$0xff] %v2094_v0  ;;  %292 = vst [vmem:[#allocation2 + $0xb8] sm:$0xff] %v2094_v0 }
  0xaf   : > { %293 = vst [vmem:[#allocation2 + $0xc0] sm:$0xff] %v2094_v0  ;;  %294 = vst [vmem:[#allocation2 + $0xc8] sm:$0xff] %v2094_v0 }
  0xb0   : > { %295 = vst [vmem:[#allocation2 + $0xd0] sm:$0xff] %v2094_v0  ;;  %296 = vst [vmem:[#allocation2 + $0xd8] sm:$0xff] %v2094_v0 }
  0xb1   : > { %297 = vst [vmem:[#allocation2 + $0xe0] sm:$0xff] %v2094_v0  ;;  %298 = vst [vmem:[#allocation2 + $0xe8] sm:$0xff] %v2094_v0 }
  0xb2   : > { %299 = vst [vmem:[#allocation2 + $0xf0] sm:$0xff] %v2094_v0  ;;  %300 = vst [vmem:[#allocation2 + $0xf8] sm:$0xff] %v2094_v0 }
  0xb3 PF: > { %v1770_v1 = vld [vmem:[%s2398_s2 + $0x40] sm:$0xff]   ;;  %v1772_v3 = vld [vmem:[%s2398_s2 + $0x48] sm:$0xff]   ;;  %v1774_v5 = vld [vmem:[%s2398_s2 + $0x50] sm:$0xff]   ;;  %s2644_s8 = sld [smem:[#allocation16_spill]] }
  0xb4   : > { %v1771_v2 = vld [vmem:[%s2398_s2] sm:$0xff]   ;;  %1404 = vmatprep.subr.bf16.mxu0 %v1770_v1  ;;  %1588 = vmatprep.subr.bf16.mxu1 %v1770_v1  ;;  %v1773_v4 = vld [vmem:[%s2398_s2 + $0x8] sm:$0xff]   ;;  %v1775_v6 = vld [vmem:[%s2398_s2 + $0x10] sm:$0xff]  }
  0xb5   : > { %1405 = vmatpush3.bf16.msra.mxu0 %v1771_v2  ;;  %1596 = vmatpush3.bf16.msra.mxu1 %v1771_v2  ;;  %v1776_v7 = vld [vmem:[%s2398_s2 + $0x58] sm:$0xff]   ;;  %v1778_v9 = vld [vmem:[%s2398_s2 + $0x60] sm:$0xff]   ;;  %v1780_v11 = vld [vmem:[%s2398_s2 + $0x68] sm:$0xff]  }
  0xb6   : > { %1406 = vmatprep.subr.bf16.mxu0 %v1772_v3  ;;  %1589 = vmatprep.subr.bf16.mxu1 %v1772_v3  ;;  %v1777_v8 = vld [vmem:[%s2398_s2 + $0x18] sm:$0xff]   ;;  %v1779_v10 = vld [vmem:[%s2398_s2 + $0x20] sm:$0xff]   ;;  %v1781_v14 = vld [vmem:[%s2398_s2 + $0x28] sm:$0xff]  }
  0xb7   : > { %v1788_v12 = vld [vmem:[%s2390_s22 + $0x4] ss:$8 sps:$4 sm:$0xff]   ;;  %v1782_v15 = vld [vmem:[%s2398_s2 + $0x70] sm:$0xff]   ;;  %v1784_v17 = vld [vmem:[%s2398_s2 + $0x78] sm:$0xff]  }
  0xb8   : > { %v1791_v13 = vld [vmem:[%s2390_s22 + $0x84] ss:$8 sps:$4 sm:$0xff]   ;;  %685 = vmatprep.mubr.bf16.mxu0 %v1788_v12  ;;  %v1783_v16 = vld [vmem:[%s2398_s2 + $0x30] sm:$0xff]   ;;  %v1785_v18 = vld [vmem:[%s2398_s2 + $0x38] sm:$0xff]  }
  0xb9   : > { %1407 = vmatpush3.bf16.msra.mxu0 %v1773_v4  ;;  %1597 = vmatpush3.bf16.msra.mxu1 %v1773_v4  ;;  %v1786_v19 = vld [vmem:[%s2390_s22] ss:$8 sps:$4 sm:$0xff]   ;;  %v1792_v21 = vld [vmem:[%s2390_s22 + $0x14] ss:$8 sps:$4 sm:$0xff]   ;;  %v1796_v23 = vld [vmem:[%s2390_s22 + $0x10] ss:$8 sps:$4 sm:$0xff]  }
  0xba   : > { %1408 = vmatprep.subr.bf16.mxu0 %v1774_v5  ;;  %1590 = vmatprep.subr.bf16.mxu1 %v1774_v5  ;;  %v1789_v20 = vld [vmem:[%s2390_s22 + $0x80] ss:$8 sps:$4 sm:$0xff]   ;;  %v1794_v22 = vld [vmem:[%s2390_s22 + $0x94] ss:$8 sps:$4 sm:$0xff]   ;;  %v1797_v24 = vld [vmem:[%s2390_s22 + $0x90] ss:$8 sps:$4 sm:$0xff]  }
  0xbb   : > { %749 = vmatprep.mubr.bf16.mxu1 %v1791_v13  ;;  %v1798_v25 = vld [vmem:[%s2390_s22 + $0x24] ss:$8 sps:$4 sm:$0xff]   ;;  %v1802_v27 = vld [vmem:[%s2390_s22 + $0x20] ss:$8 sps:$4 sm:$0xff]   ;;  %v1804_v29 = vld [vmem:[%s2390_s22 + $0x34] ss:$8 sps:$4 sm:$0xff]  }
  0xbc   : > { %v1800_v26 = vld [vmem:[%s2390_s22 + $0xa4] ss:$8 sps:$4 sm:$0xff]   ;;  %v1803_v28 = vld [vmem:[%s2390_s22 + $0xa0] ss:$8 sps:$4 sm:$0xff]   ;;  %v1806_v30 = vld [vmem:[%s2390_s22 + $0xb4] ss:$8 sps:$4 sm:$0xff]  }
  0xbd   : > { %1409 = vmatpush3.bf16.msra.mxu0 %v1775_v6  ;;  %1598 = vmatpush3.bf16.msra.mxu1 %v1775_v6  ;;  %v1808_v31 = vld [vmem:[%s2390_s22 + $0x30] ss:$8 sps:$4 sm:$0xff]   ;;  %v1810_v33 = vld [vmem:[%s2390_s22 + $0x44] ss:$8 sps:$4 sm:$0xff]   ;;  %v1814_v35 = vld [vmem:[%s2390_s22 + $0x40] ss:$8 sps:$4 sm:$0xff]  }
  0xbe   : > { %1410 = vmatprep.subr.bf16.mxu0 %v1776_v7  ;;  %1591 = vmatprep.subr.bf16.mxu1 %v1776_v7  ;;  %v1809_v32 = vld [vmem:[%s2390_s22 + $0xb0] ss:$8 sps:$4 sm:$0xff]   ;;  %v1812_v34 = vld [vmem:[%s2390_s22 + $0xc4] ss:$8 sps:$4 sm:$0xff]   ;;  %v1815_v36 = vld [vmem:[%s2390_s22 + $0xc0] ss:$8 sps:$4 sm:$0xff]  }
  0xbf   : > { %v1816_v37 = vld [vmem:[%s2390_s22 + $0x54] ss:$8 sps:$4 sm:$0xff]   ;;  %v1820_v39 = vld [vmem:[%s2390_s22 + $0x50] ss:$8 sps:$4 sm:$0xff]   ;;  %v1822_v41 = vld [vmem:[%s2390_s22 + $0x64] ss:$8 sps:$4 sm:$0xff]  }
  0xc0   : > { %v1818_v38 = vld [vmem:[%s2390_s22 + $0xd4] ss:$8 sps:$4 sm:$0xff]   ;;  %v1821_v40 = vld [vmem:[%s2390_s22 + $0xd0] ss:$8 sps:$4 sm:$0xff]   ;;  %v1824_v42 = vld [vmem:[%s2390_s22 + $0xe4] ss:$8 sps:$4 sm:$0xff]  }
  0xc1   : > { %1411 = vmatpush3.bf16.msra.mxu0 %v1777_v8  ;;  %1599 = vmatpush3.bf16.msra.mxu1 %v1777_v8  ;;  %v1826_v43 = vld [vmem:[%s2390_s22 + $0x60] ss:$8 sps:$4 sm:$0xff]   ;;  %v1828_v45 = vld [vmem:[%s2390_s22 + $0x74] ss:$8 sps:$4 sm:$0xff]   ;;  %v1832_v47 = vld [vmem:[%s2390_s22 + $0x70] ss:$8 sps:$4 sm:$0xff]  }
  0xc2   : > { %1412 = vmatprep.subr.bf16.mxu0 %v1778_v9  ;;  %1592 = vmatprep.subr.bf16.mxu1 %v1778_v9  ;;  %v1827_v44 = vld [vmem:[%s2390_s22 + $0xe0] ss:$8 sps:$4 sm:$0xff]   ;;  %v1830_v46 = vld [vmem:[%s2390_s22 + $0xf4] ss:$8 sps:$4 sm:$0xff]   ;;  %v1833_v48 = vld [vmem:[%s2390_s22 + $0xf0] ss:$8 sps:$4 sm:$0xff]  }
  0xc3   : > { %v301_v51 = vld [vmem:[#allocation2] sm:$0xff]  ;;  %v302_v59 = vld [vmem:[#allocation2 + $0x8] sm:$0xff]  ;;  %v303_v7 = vld [vmem:[#allocation2 + $0x10] sm:$0xff]  ;;  %p1387_p5 = scmp.ne.s32.totalorder %s2644_s8, 1 }
  0xc4   : > { %v317_v53 = vld [vmem:[#allocation2 + $0x80] sm:$0xff]  ;;  %v318_v61 = vld [vmem:[#allocation2 + $0x88] sm:$0xff]  ;;  %v319_v9 = vld [vmem:[#allocation2 + $0x90] sm:$0xff] }
  0xc5   : > { %1413 = vmatpush3.bf16.msra.mxu0 %v1779_v10  ;;  %1600 = vmatpush3.bf16.msra.mxu1 %v1779_v10 }
  0xc6   : > { %1414 = vmatprep.subr.bf16.mxu0 %v1780_v11  ;;  %1593 = vmatprep.subr.bf16.mxu1 %v1780_v11 }
  0xc9   : > { %1415 = vmatpush3.bf16.msra.mxu0 %v1781_v14  ;;  %1601 = vmatpush3.bf16.msra.mxu1 %v1781_v14 }
  0xca   : > { %1416 = vmatprep.subr.bf16.mxu0 %v1782_v15  ;;  %1594 = vmatprep.subr.bf16.mxu1 %v1782_v15  ;;  %v304_v15 = vld [vmem:[#allocation2 + $0x18] sm:$0xff] }
  0xcd   : > { %1417 = vmatpush3.bf16.msra.mxu0 %v1783_v16  ;;  %1602 = vmatpush3.bf16.msra.mxu1 %v1783_v16 }
  0xce   : > { %1418 = vmatprep.subr.bf16.mxu0 %v1784_v17  ;;  %1595 = vmatprep.subr.bf16.mxu1 %v1784_v17  ;;  %v320_v17 = vld [vmem:[#allocation2 + $0x98] sm:$0xff] }
  0xd1   : > { %1419 = vmatpush3.bf16.msra.mxu0 %v1785_v18  ;;  %1603 = vmatpush3.bf16.msra.mxu1 %v1785_v18 }
  0xd4   : > { %686 = vmatmul.mubr.bf16.vlgmr.msra.gmra.mrb[0].mxu0 %v1786_v19  ;;  %750 = vmatmul.mubr.bf16.vlgmr.msra.gmra.mrb[0].mxu1 %v1789_v20 }
  0xd5   : > { %693 = vmatprep.mubr.bf16.mxu0 %v1792_v21  ;;  %757 = vmatprep.mubr.bf16.mxu1 %v1794_v22 }
  0xdc   : > { %694 = vmatmul.mubr.bf16.gmra.mrb[4].mxu0 %v1796_v23  ;;  %758 = vmatmul.mubr.bf16.gmra.mrb[4].mxu1 %v1797_v24 }
  0xdd   : > { %701 = vmatprep.mubr.bf16.mxu0 %v1798_v25  ;;  %765 = vmatprep.mubr.bf16.mxu1 %v1800_v26 }
  0xe4   : > { %702 = vmatmul.mubr.bf16.gmra.mrb[8].mxu0 %v1802_v27  ;;  %766 = vmatmul.mubr.bf16.gmra.mrb[8].mxu1 %v1803_v28  ;;  %v305_v27 = vld [vmem:[#allocation2 + $0x20] sm:$0xff] }
  0xe5   : > { %709 = vmatprep.mubr.bf16.mxu0 %v1804_v29  ;;  %773 = vmatprep.mubr.bf16.mxu1 %v1806_v30  ;;  %v321_v29 = vld [vmem:[#allocation2 + $0xa0] sm:$0xff] }
  0xec   : > { %710 = vmatmul.mubr.bf16.gmra.mrb[12].mxu0 %v1808_v31  ;;  %774 = vmatmul.mubr.bf16.gmra.mrb[12].mxu1 %v1809_v32 }
  0xed   : > { %717 = vmatprep.mubr.bf16.mxu0 %v1810_v33  ;;  %781 = vmatprep.mubr.bf16.mxu1 %v1812_v34 }
  0xf4   : > { %718 = vmatmul.mubr.bf16.gmra.mrb[16].mxu0 %v1814_v35  ;;  %782 = vmatmul.mubr.bf16.gmra.mrb[16].mxu1 %v1815_v36  ;;  %v306_v35 = vld [vmem:[#allocation2 + $0x28] sm:$0xff] }
  0xf5   : > { %725 = vmatprep.mubr.bf16.mxu0 %v1816_v37  ;;  %789 = vmatprep.mubr.bf16.mxu1 %v1818_v38  ;;  %v322_v37 = vld [vmem:[#allocation2 + $0xa8] sm:$0xff] }
  0xfc   : > { %726 = vmatmul.mubr.bf16.gmra.mrb[20].mxu0 %v1820_v39  ;;  %790 = vmatmul.mubr.bf16.gmra.mrb[20].mxu1 %v1821_v40 }
  0xfd   : > { %733 = vmatprep.mubr.bf16.mxu0 %v1822_v41  ;;  %797 = vmatprep.mubr.bf16.mxu1 %v1824_v42 }
 0x104   : > { %734 = vmatmul.mubr.bf16.gmra.mrb[24].mxu0 %v1826_v43  ;;  %798 = vmatmul.mubr.bf16.gmra.mrb[24].mxu1 %v1827_v44 }
 0x105   : > { %741 = vmatprep.mubr.bf16.mxu0 %v1828_v45  ;;  %805 = vmatprep.mubr.bf16.mxu1 %v1830_v46 }
 0x10c   : > { %742 = vmatmul.mubr.bf16.gmra.mrb[28].mxu0 %v1832_v47  ;;  %806 = vmatmul.mubr.bf16.gmra.mrb[28].mxu1 %v1833_v48  ;;  %v307_v47 = vld [vmem:[#allocation2 + $0x30] sm:$0xff] }
 0x1a7   : > { %v1420_v49 = vpop.f32.mrb[0].mxu0  ;;  %v1468_v50 = vpop.f32.mrb[0].mxu1 }
 0x1a8   : > { %v1421_v52 = vpop.f32.mrb[1].mxu0  ;;  %v1469_v54 = vpop.f32.mrb[1].mxu1 }
 0x1a9   : > { %v1422_v55 = vadd.f32 %v1421_v52, %v1420_v49  ;;  %v1470_v56 = vadd.f32 %v1469_v54, %v1468_v50  ;;  %v1423_v57 = vpop.f32.mrb[2].mxu0  ;;  %v1471_v58 = vpop.f32.mrb[2].mxu1  ;;  %v323_v49 = vld [vmem:[#allocation2 + $0xb0] sm:$0xff] }
 0x1aa   : > { %v1424_v60 = vpop.f32.mrb[3].mxu0  ;;  %v1472_v62 = vpop.f32.mrb[3].mxu1 }
 0x1ab   : > { %v814_v63 = vadd.f32 %v1422_v55, %v301_v51  ;;  %v830_v0 = vadd.f32 %v1470_v56, %v317_v53  ;;  %v1425_v1 = vadd.f32 %v1424_v60, %v1423_v57  ;;  %v1473_v2 = vadd.f32 %v1472_v62, %v1471_v58  ;;  %v308_v55 = vld [vmem:[#allocation2 + $0x38] sm:$0xff] }
 0x1ac   : > { %v324_v57 = vld [vmem:[#allocation2 + $0xb8] sm:$0xff] }
 0x1ad   : > { %846 = vst [vmem:[#allocation2] sm:$0xff] %v814_v63  ;;  %862 = vst [vmem:[#allocation2 + $0x80] sm:$0xff] %v830_v0  ;;  %v815_v3 = vadd.f32 %v1425_v1, %v302_v59  ;;  %v831_v4 = vadd.f32 %v1473_v2, %v318_v61 }
 0x1af   : > { %847 = vst [vmem:[#allocation2 + $0x8] sm:$0xff] %v815_v3  ;;  %863 = vst [vmem:[#allocation2 + $0x88] sm:$0xff] %v831_v4  ;;  %v1426_v5 = vpop.f32.mrb[4].mxu0  ;;  %v1474_v6 = vpop.f32.mrb[4].mxu1  ;;  %v309_v3 = vld [vmem:[#allocation2 + $0x40] sm:$0xff] }
 0x1b0   : > { %v1427_v8 = vpop.f32.mrb[5].mxu0  ;;  %v1475_v10 = vpop.f32.mrb[5].mxu1 }
 0x1b1   : > { %v1428_v11 = vadd.f32 %v1427_v8, %v1426_v5  ;;  %v1476_v12 = vadd.f32 %v1475_v10, %v1474_v6  ;;  %v1429_v13 = vpop.f32.mrb[6].mxu0  ;;  %v1477_v14 = vpop.f32.mrb[6].mxu1  ;;  %v325_v5 = vld [vmem:[#allocation2 + $0xc0] sm:$0xff] }
 0x1b2   : > { %v1430_v16 = vpop.f32.mrb[7].mxu0  ;;  %v1478_v18 = vpop.f32.mrb[7].mxu1 }
 0x1b3   : > { %v816_v19 = vadd.f32 %v1428_v11, %v303_v7  ;;  %v832_v20 = vadd.f32 %v1476_v12, %v319_v9  ;;  %v1431_v21 = vadd.f32 %v1430_v16, %v1429_v13  ;;  %v1479_v22 = vadd.f32 %v1478_v18, %v1477_v14  ;;  %v310_v11 = vld [vmem:[#allocation2 + $0x48] sm:$0xff] }
 0x1b4   : > { %v326_v13 = vld [vmem:[#allocation2 + $0xc8] sm:$0xff] }
 0x1b5   : > { %848 = vst [vmem:[#allocation2 + $0x10] sm:$0xff] %v816_v19  ;;  %864 = vst [vmem:[#allocation2 + $0x90] sm:$0xff] %v832_v20  ;;  %v817_v23 = vadd.f32 %v1431_v21, %v304_v15  ;;  %v833_v24 = vadd.f32 %v1479_v22, %v320_v17 }
 0x1b7   : > { %849 = vst [vmem:[#allocation2 + $0x18] sm:$0xff] %v817_v23  ;;  %865 = vst [vmem:[#allocation2 + $0x98] sm:$0xff] %v833_v24  ;;  %v1432_v25 = vpop.f32.mrb[8].mxu0  ;;  %v1480_v26 = vpop.f32.mrb[8].mxu1  ;;  %v311_v23 = vld [vmem:[#allocation2 + $0x50] sm:$0xff] }
 0x1b8   : > { %v1433_v28 = vpop.f32.mrb[9].mxu0  ;;  %v1481_v30 = vpop.f32.mrb[9].mxu1 }
 0x1b9   : > { %v1434_v31 = vadd.f32 %v1433_v28, %v1432_v25  ;;  %v1482_v32 = vadd.f32 %v1481_v30, %v1480_v26  ;;  %v1435_v33 = vpop.f32.mrb[10].mxu0  ;;  %v1483_v34 = vpop.f32.mrb[10].mxu1  ;;  %v327_v25 = vld [vmem:[#allocation2 + $0xd0] sm:$0xff] }
 0x1ba   : > { %v1436_v36 = vpop.f32.mrb[11].mxu0  ;;  %v1484_v38 = vpop.f32.mrb[11].mxu1 }
 0x1bb   : > { %v818_v39 = vadd.f32 %v1434_v31, %v305_v27  ;;  %v834_v40 = vadd.f32 %v1482_v32, %v321_v29  ;;  %v1437_v41 = vadd.f32 %v1436_v36, %v1435_v33  ;;  %v1485_v42 = vadd.f32 %v1484_v38, %v1483_v34  ;;  %v312_v31 = vld [vmem:[#allocation2 + $0x58] sm:$0xff] }
 0x1bc   : > { %v328_v33 = vld [vmem:[#allocation2 + $0xd8] sm:$0xff] }
 0x1bd   : > { %850 = vst [vmem:[#allocation2 + $0x20] sm:$0xff] %v818_v39  ;;  %866 = vst [vmem:[#allocation2 + $0xa0] sm:$0xff] %v834_v40  ;;  %v819_v43 = vadd.f32 %v1437_v41, %v306_v35  ;;  %v835_v44 = vadd.f32 %v1485_v42, %v322_v37 }
 0x1bf   : > { %851 = vst [vmem:[#allocation2 + $0x28] sm:$0xff] %v819_v43  ;;  %867 = vst [vmem:[#allocation2 + $0xa8] sm:$0xff] %v835_v44  ;;  %v1438_v45 = vpop.f32.mrb[12].mxu0  ;;  %v1486_v46 = vpop.f32.mrb[12].mxu1  ;;  %v313_v43 = vld [vmem:[#allocation2 + $0x60] sm:$0xff] }
 0x1c0   : > { %v1439_v48 = vpop.f32.mrb[13].mxu0  ;;  %v1487_v50 = vpop.f32.mrb[13].mxu1 }
 0x1c1   : > { %v1440_v51 = vadd.f32 %v1439_v48, %v1438_v45  ;;  %v1488_v52 = vadd.f32 %v1487_v50, %v1486_v46  ;;  %v1441_v53 = vpop.f32.mrb[14].mxu0  ;;  %v1489_v54 = vpop.f32.mrb[14].mxu1  ;;  %v329_v45 = vld [vmem:[#allocation2 + $0xe0] sm:$0xff] }
 0x1c2   : > { %v1442_v56 = vpop.f32.mrb[15].mxu0  ;;  %v1490_v58 = vpop.f32.mrb[15].mxu1 }
 0x1c3   : > { %v820_v59 = vadd.f32 %v1440_v51, %v307_v47  ;;  %v836_v60 = vadd.f32 %v1488_v52, %v323_v49  ;;  %v1443_v61 = vadd.f32 %v1442_v56, %v1441_v53  ;;  %v1491_v62 = vadd.f32 %v1490_v58, %v1489_v54  ;;  %v314_v51 = vld [vmem:[#allocation2 + $0x68] sm:$0xff] }
 0x1c4   : > { %v330_v53 = vld [vmem:[#allocation2 + $0xe8] sm:$0xff] }
 0x1c5   : > { %852 = vst [vmem:[#allocation2 + $0x30] sm:$0xff] %v820_v59  ;;  %868 = vst [vmem:[#allocation2 + $0xb0] sm:$0xff] %v836_v60  ;;  %v821_v63 = vadd.f32 %v1443_v61, %v308_v55  ;;  %v837_v0 = vadd.f32 %v1491_v62, %v324_v57 }
 0x1c7   : > { %853 = vst [vmem:[#allocation2 + $0x38] sm:$0xff] %v821_v63  ;;  %869 = vst [vmem:[#allocation2 + $0xb8] sm:$0xff] %v837_v0  ;;  %v1444_v1 = vpop.f32.mrb[16].mxu0  ;;  %v1492_v2 = vpop.f32.mrb[16].mxu1  ;;  %v315_v63 = vld [vmem:[#allocation2 + $0x70] sm:$0xff] }
 0x1c8   : > { %v1445_v4 = vpop.f32.mrb[17].mxu0  ;;  %v1493_v6 = vpop.f32.mrb[17].mxu1 }
 0x1c9   : > { %v1446_v7 = vadd.f32 %v1445_v4, %v1444_v1  ;;  %v1494_v8 = vadd.f32 %v1493_v6, %v1492_v2  ;;  %v1447_v9 = vpop.f32.mrb[18].mxu0  ;;  %v1495_v10 = vpop.f32.mrb[18].mxu1  ;;  %v331_v1 = vld [vmem:[#allocation2 + $0xf0] sm:$0xff] }
 0x1ca   : > { %v1448_v12 = vpop.f32.mrb[19].mxu0  ;;  %v1496_v14 = vpop.f32.mrb[19].mxu1 }
 0x1cb   : > { %v822_v15 = vadd.f32 %v1446_v7, %v309_v3  ;;  %v838_v16 = vadd.f32 %v1494_v8, %v325_v5  ;;  %v1449_v17 = vadd.f32 %v1448_v12, %v1447_v9  ;;  %v1497_v18 = vadd.f32 %v1496_v14, %v1495_v10  ;;  %v316_v7 = vld [vmem:[#allocation2 + $0x78] sm:$0xff] }
 0x1cc   : > { %v332_v9 = vld [vmem:[#allocation2 + $0xf8] sm:$0xff] }
 0x1cd   : > { %854 = vst [vmem:[#allocation2 + $0x40] sm:$0xff] %v822_v15  ;;  %870 = vst [vmem:[#allocation2 + $0xc0] sm:$0xff] %v838_v16  ;;  %v823_v19 = vadd.f32 %v1449_v17, %v310_v11  ;;  %v839_v20 = vadd.f32 %v1497_v18, %v326_v13  ;;  %v1834_v17 = vld [vmem:[#allocation8] sm:$0xff] (!%p1387_p5)   ;;  %v1835_v18 = vld [vmem:[#allocation8 + $0x8] sm:$0xff] (!%p1387_p5)  }
 0x1ce   : > { %1540 = vmatprep.subr.bf16.mxu0 (!%p1387_p5), %v1834_v17  ;;  %1604 = vmatprep.subr.bf16.mxu1 (!%p1387_p5), %v1834_v17 }
 0x1cf   : > { %855 = vst [vmem:[#allocation2 + $0x48] sm:$0xff] %v823_v19  ;;  %871 = vst [vmem:[#allocation2 + $0xc8] sm:$0xff] %v839_v20  ;;  %v1450_v21 = vpop.f32.mrb[20].mxu0  ;;  %v1498_v22 = vpop.f32.mrb[20].mxu1  ;;  %1541 = vmatpush3.bf16.msra.mxu0 (!%p1387_p5), %v1834_v17  ;;  %1612 = vmatpush3.bf16.msra.mxu1 (!%p1387_p5), %v1834_v17  ;;  %v1836_v19 = vld [vmem:[#allocation8 + $0x10] sm:$0xff] (!%p1387_p5)   ;;  %v1837_v20 = vld [vmem:[#allocation8 + $0x18] sm:$0xff] (!%p1387_p5)  }
 0x1d0   : > { %v1451_v24 = vpop.f32.mrb[21].mxu0  ;;  %v1499_v26 = vpop.f32.mrb[21].mxu1  ;;  %1542 = vmatprep.subr.bf16.mxu0 (!%p1387_p5), %v1835_v18  ;;  %1605 = vmatprep.subr.bf16.mxu1 (!%p1387_p5), %v1835_v18 }
 0x1d1   : > { %v1452_v27 = vadd.f32 %v1451_v24, %v1450_v21  ;;  %v1500_v28 = vadd.f32 %v1499_v26, %v1498_v22  ;;  %v1453_v29 = vpop.f32.mrb[22].mxu0  ;;  %v1501_v30 = vpop.f32.mrb[22].mxu1  ;;  %v882_v21 = vld [vmem:[#allocation2] sm:$0xff] (!%p1387_p5)  ;;  %v883_v22 = vld [vmem:[#allocation2 + $0x8] sm:$0xff] (!%p1387_p5) }
 0x1d2   : > { %v1454_v32 = vpop.f32.mrb[23].mxu0  ;;  %v1502_v34 = vpop.f32.mrb[23].mxu1  ;;  %v914_v24 = vpack.c.bf16 (!%p1387_p5), %v883_v22, %v882_v21 }
 0x1d3   : > { %v824_v35 = vadd.f32 %v1452_v27, %v311_v23  ;;  %v840_v36 = vadd.f32 %v1500_v28, %v327_v25  ;;  %v1455_v37 = vadd.f32 %v1454_v32, %v1453_v29  ;;  %v1503_v38 = vadd.f32 %v1502_v34, %v1501_v30  ;;  %1543 = vmatpush3.bf16.msra.mxu0 (!%p1387_p5), %v1835_v18  ;;  %v898_v23 = vld [vmem:[#allocation2 + $0x80] sm:$0xff] (!%p1387_p5)  ;;  %v899_v25 = vld [vmem:[#allocation2 + $0x88] sm:$0xff] (!%p1387_p5)  ;;  %v1840_v29 = vld [vmem:[#allocation8 + $0x30] sm:$0xff] (!%p1387_p5)  }
 0x1d4   : > { %1613 = vmatpush3.bf16.msra.mxu1 (!%p1387_p5), %v1835_v18  ;;  %1544 = vmatprep.subr.bf16.mxu0 (!%p1387_p5), %v1836_v19  ;;  %v922_v26 = vpack.c.bf16 (!%p1387_p5), %v899_v25, %v898_v23  ;;  %v1838_v27 = vld [vmem:[#allocation8 + $0x20] sm:$0xff] (!%p1387_p5)   ;;  %v1839_v28 = vld [vmem:[#allocation8 + $0x28] sm:$0xff] (!%p1387_p5)   ;;  %v1841_v30 = vld [vmem:[#allocation8 + $0x38] sm:$0xff] (!%p1387_p5)  }
 0x1d5   : > { %856 = vst [vmem:[#allocation2 + $0x50] sm:$0xff] %v824_v35  ;;  %872 = vst [vmem:[#allocation2 + $0xd0] sm:$0xff] %v840_v36  ;;  %v825_v39 = vadd.f32 %v1455_v37, %v312_v31  ;;  %v841_v40 = vadd.f32 %v1503_v38, %v328_v33  ;;  %1606 = vmatprep.subr.bf16.mxu1 (!%p1387_p5), %v1836_v19  ;;  %1556 = vmatprep.mubr.bf16.mxu0 (!%p1387_p5), %v914_v24  ;;  %v884_v31 = vld [vmem:[#allocation2 + $0x10] sm:$0xff] (!%p1387_p5)  ;;  %v885_v32 = vld [vmem:[#allocation2 + $0x18] sm:$0xff] (!%p1387_p5) }
 0x1d6   : > { %1572 = vmatprep.mubr.bf16.mxu1 (!%p1387_p5), %v922_v26  ;;  %v900_v33 = vld [vmem:[#allocation2 + $0x90] sm:$0xff] (!%p1387_p5)  ;;  %v901_v34 = vld [vmem:[#allocation2 + $0x98] sm:$0xff] (!%p1387_p5)  ;;  %v886_v35 = vld [vmem:[#allocation2 + $0x20] sm:$0xff] (!%p1387_p5) }
 0x1d7   : > { %857 = vst [vmem:[#allocation2 + $0x58] sm:$0xff] %v825_v39  ;;  %873 = vst [vmem:[#allocation2 + $0xd8] sm:$0xff] %v841_v40  ;;  %v1456_v41 = vpop.f32.mrb[24].mxu0  ;;  %v1504_v42 = vpop.f32.mrb[24].mxu1  ;;  %1545 = vmatpush3.bf16.msra.mxu0 (!%p1387_p5), %v1836_v19  ;;  %v887_v36 = vld [vmem:[#allocation2 + $0x28] sm:$0xff] (!%p1387_p5)  ;;  %v902_v37 = vld [vmem:[#allocation2 + $0xa0] sm:$0xff] (!%p1387_p5)  ;;  %v915_v39 = vpack.c.bf16 (!%p1387_p5), %v885_v32, %v884_v31  ;;  %v923_v40 = vpack.c.bf16 (!%p1387_p5), %v901_v34, %v900_v33 }
 0x1d8   : > { %v1457_v44 = vpop.f32.mrb[25].mxu0  ;;  %v1505_v46 = vpop.f32.mrb[25].mxu1  ;;  %1614 = vmatpush3.bf16.msra.mxu1 (!%p1387_p5), %v1836_v19  ;;  %1546 = vmatprep.subr.bf16.mxu0 (!%p1387_p5), %v1837_v20  ;;  %v903_v38 = vld [vmem:[#allocation2 + $0xa8] sm:$0xff] (!%p1387_p5) }
 0x1d9   : > { %v1458_v47 = vadd.f32 %v1457_v44, %v1456_v41  ;;  %v1506_v48 = vadd.f32 %v1505_v46, %v1504_v42  ;;  %v1459_v49 = vpop.f32.mrb[26].mxu0  ;;  %v1507_v50 = vpop.f32.mrb[26].mxu1  ;;  %1607 = vmatprep.subr.bf16.mxu1 (!%p1387_p5), %v1837_v20  ;;  %v916_v41 = vpack.c.bf16 (!%p1387_p5), %v887_v36, %v886_v35  ;;  %v924_v42 = vpack.c.bf16 (!%p1387_p5), %v903_v38, %v902_v37  ;;  %v889_v44 = vld [vmem:[#allocation2 + $0x38] sm:$0xff] (!%p1387_p5) }
 0x1da   : > { %v1460_v52 = vpop.f32.mrb[27].mxu0  ;;  %v1508_v54 = vpop.f32.mrb[27].mxu1  ;;  %v905_v46 = vld [vmem:[#allocation2 + $0xb8] sm:$0xff] (!%p1387_p5) }
 0x1db   : > { %v826_v55 = vadd.f32 %v1458_v47, %v313_v43  ;;  %v842_v56 = vadd.f32 %v1506_v48, %v329_v45  ;;  %v1461_v57 = vadd.f32 %v1460_v52, %v1459_v49  ;;  %v1509_v58 = vadd.f32 %v1508_v54, %v1507_v50  ;;  %1547 = vmatpush3.bf16.msra.mxu0 (!%p1387_p5), %v1837_v20  ;;  %v888_v43 = vld [vmem:[#allocation2 + $0x30] sm:$0xff] (!%p1387_p5)  ;;  %v890_v47 = vld [vmem:[#allocation2 + $0x40] sm:$0xff] (!%p1387_p5)  ;;  %v891_v48 = vld [vmem:[#allocation2 + $0x48] sm:$0xff] (!%p1387_p5) }
 0x1dc   : > { %1615 = vmatpush3.bf16.msra.mxu1 (!%p1387_p5), %v1837_v20  ;;  %1548 = vmatprep.subr.bf16.mxu0 (!%p1387_p5), %v1838_v27  ;;  %v904_v45 = vld [vmem:[#allocation2 + $0xb0] sm:$0xff] (!%p1387_p5)  ;;  %v906_v49 = vld [vmem:[#allocation2 + $0xc0] sm:$0xff] (!%p1387_p5)  ;;  %v907_v50 = vld [vmem:[#allocation2 + $0xc8] sm:$0xff] (!%p1387_p5) }
 0x1dd   : > { %858 = vst [vmem:[#allocation2 + $0x60] sm:$0xff] %v826_v55  ;;  %874 = vst [vmem:[#allocation2 + $0xe0] sm:$0xff] %v842_v56  ;;  %v827_v59 = vadd.f32 %v1461_v57, %v314_v51  ;;  %v843_v60 = vadd.f32 %v1509_v58, %v330_v53  ;;  %1608 = vmatprep.subr.bf16.mxu1 (!%p1387_p5), %v1838_v27  ;;  %v917_v51 = vpack.c.bf16 (!%p1387_p5), %v889_v44, %v888_v43  ;;  %v892_v55 = vld [vmem:[#allocation2 + $0x50] sm:$0xff] (!%p1387_p5) }
 0x1de   : > { %v925_v52 = vpack.c.bf16 (!%p1387_p5), %v905_v46, %v904_v45  ;;  %v918_v53 = vpack.c.bf16 (!%p1387_p5), %v891_v48, %v890_v47  ;;  %v926_v54 = vpack.c.bf16 (!%p1387_p5), %v907_v50, %v906_v49  ;;  %v893_v56 = vld [vmem:[#allocation2 + $0x58] sm:$0xff] (!%p1387_p5)  ;;  %v908_v57 = vld [vmem:[#allocation2 + $0xd0] sm:$0xff] (!%p1387_p5) }
 0x1df   : > { %859 = vst [vmem:[#allocation2 + $0x68] sm:$0xff] %v827_v59  ;;  %875 = vst [vmem:[#allocation2 + $0xe8] sm:$0xff] %v843_v60  ;;  %v1462_v61 = vpop.f32.mrb[28].mxu0  ;;  %v1510_v62 = vpop.f32.mrb[28].mxu1  ;;  %1549 = vmatpush3.bf16.msra.mxu0 (!%p1387_p5), %v1838_v27  ;;  %v909_v58 = vld [vmem:[#allocation2 + $0xd8] sm:$0xff] (!%p1387_p5) }
 0x1e0   : > { %v1463_v0 = vpop.f32.mrb[29].mxu0  ;;  %v1511_v2 = vpop.f32.mrb[29].mxu1  ;;  %1616 = vmatpush3.bf16.msra.mxu1 (!%p1387_p5), %v1838_v27  ;;  %1550 = vmatprep.subr.bf16.mxu0 (!%p1387_p5), %v1839_v28 }
 0x1e1   : > { %v1464_v3 = vadd.f32 %v1463_v0, %v1462_v61  ;;  %v1512_v4 = vadd.f32 %v1511_v2, %v1510_v62  ;;  %v1465_v5 = vpop.f32.mrb[30].mxu0  ;;  %v1513_v6 = vpop.f32.mrb[30].mxu1  ;;  %881 = sbr.rel (%p1387_p5) target bundleno = 735 (0x2df), region = 52  ;;  %1609 = vmatprep.subr.bf16.mxu1 (!%p1387_p5), %v1839_v28  ;;  %v927_v0 = vpack.c.bf16 (!%p1387_p5), %v909_v58, %v908_v57 }
 0x1e2   : > { %v1466_v8 = vpop.f32.mrb[31].mxu0  ;;  %v1514_v10 = vpop.f32.mrb[31].mxu1 }
 0x1e3   : > { %v828_v11 = vadd.f32 %v1464_v3, %v315_v63  ;;  %v844_v12 = vadd.f32 %v1512_v4, %v331_v1  ;;  %v1467_v13 = vadd.f32 %v1466_v8, %v1465_v5  ;;  %v1515_v14 = vadd.f32 %v1514_v10, %v1513_v6  ;;  %1551 = vmatpush3.bf16.msra.mxu0 (!%p1387_p5), %v1839_v28 }
 0x1e4   : > { %1617 = vmatpush3.bf16.msra.mxu1 (!%p1387_p5), %v1839_v28  ;;  %1552 = vmatprep.subr.bf16.mxu0 (!%p1387_p5), %v1840_v29  ;;  %v894_v59 = vld [vmem:[#allocation2 + $0x60] sm:$0xff] (!%p1387_p5)  ;;  %v919_v63 = vpack.c.bf16 (!%p1387_p5), %v893_v56, %v892_v55 }
 0x1e5   : > { %860 = vst [vmem:[#allocation2 + $0x70] sm:$0xff] %v828_v11  ;;  %876 = vst [vmem:[#allocation2 + $0xf0] sm:$0xff] %v844_v12  ;;  %v829_v15 = vadd.f32 %v1467_v13, %v316_v7  ;;  %v845_v16 = vadd.f32 %v1515_v14, %v332_v9  ;;  %1610 = vmatprep.subr.bf16.mxu1 (!%p1387_p5), %v1840_v29  ;;  %v910_v61 = vld [vmem:[#allocation2 + $0xe0] sm:$0xff] (!%p1387_p5) }
 0x1e6   : > { %v895_v60 = vld [vmem:[#allocation2 + $0x68] sm:$0xff] (!%p1387_p5) }
 0x1e7   : > { %861 = vst [vmem:[#allocation2 + $0x78] sm:$0xff] %v829_v15  ;;  %877 = vst [vmem:[#allocation2 + $0xf8] sm:$0xff] %v845_v16  ;;  %1553 = vmatpush3.bf16.msra.mxu0 (!%p1387_p5), %v1840_v29  ;;  %v911_v62 = vld [vmem:[#allocation2 + $0xe8] sm:$0xff] (!%p1387_p5)  ;;  %v920_v1 = vpack.c.bf16 (!%p1387_p5), %v895_v60, %v894_v59 }
 0x1e8   : > { %1618 = vmatpush3.bf16.msra.mxu1 %v1840_v29  ;;  %1554 = vmatprep.subr.bf16.mxu0 %v1841_v30  ;;  %v928_v2 = vpack.c.bf16 %v911_v62, %v910_v61 }
 0x1e9   : > { %1611 = vmatprep.subr.bf16.mxu1 %v1841_v30 }
 0x1eb   : > { %1555 = vmatpush3.bf16.msra.mxu0 %v1841_v30 }
 0x1ec   : > { %1619 = vmatpush3.bf16.msra.mxu1 %v1841_v30  ;;  %v896_v3 = vld [vmem:[#allocation2 + $0x70] sm:$0xff] }
 0x1ed   : > { %v912_v5 = vld [vmem:[#allocation2 + $0xf0] sm:$0xff] }
 0x1ee   : > { %1557 = vmatmul.mubr.bf16.vlgmr.msra.gmra.mrb[0].mxu0 %v915_v39  ;;  %v897_v4 = vld [vmem:[#allocation2 + $0x78] sm:$0xff] }
 0x1ef   : > { %1573 = vmatmul.mubr.bf16.vlgmr.msra.gmra.mrb[0].mxu1 %v923_v40  ;;  %1560 = vmatprep.mubr.bf16.mxu0 %v916_v41  ;;  %v913_v6 = vld [vmem:[#allocation2 + $0xf8] sm:$0xff]  ;;  %v921_v7 = vpack.c.bf16 %v897_v4, %v896_v3 }
 0x1f0   : > { %1576 = vmatprep.mubr.bf16.mxu1 %v924_v42  ;;  %v929_v8 = vpack.c.bf16 %v913_v6, %v912_v5 }
 0x1f6   : > { %1561 = vmatmul.mubr.bf16.gmra.mrb[4].mxu0 %v917_v51 }
 0x1f7   : > { %1577 = vmatmul.mubr.bf16.gmra.mrb[4].mxu1 %v925_v52  ;;  %1564 = vmatprep.mubr.bf16.mxu0 %v918_v53 }
 0x1f8   : > { %1580 = vmatprep.mubr.bf16.mxu1 %v926_v54 }
 0x1fe   : > { %1565 = vmatmul.mubr.bf16.gmra.mrb[8].mxu0 %v919_v63 }
 0x1ff   : > { %1581 = vmatmul.mubr.bf16.gmra.mrb[8].mxu1 %v927_v0  ;;  %1568 = vmatprep.mubr.bf16.mxu0 %v920_v1 }
 0x200   : > { %1584 = vmatprep.mubr.bf16.mxu1 %v928_v2 }
 0x206   : > { %1569 = vmatmul.mubr.bf16.gmra.mrb[12].mxu0 %v921_v7 }
 0x207   : > { %1585 = vmatmul.mubr.bf16.gmra.mrb[12].mxu1 %v929_v8 }
 0x2c1   : > { %v1558_v9 = vpop.f32.mrb[0].mxu0 }
 0x2c2   : > { %v1574_v10 = vpop.f32.mrb[0].mxu1  ;;  %1157 = vst [vmem:[%s2411_s28 + $0x10] sm:$0xff] %v1558_v9  ;;  %v1028_v11 = vpop.f32.mrb[1].mxu0 }
 0x2c3   : > { %1173 = vst [vmem:[%s2411_s28 + $0x90] sm:$0xff] %v1574_v10  ;;  %v1092_v12 = vpop.f32.mrb[1].mxu1  ;;  %1155 = vst [vmem:[%s2411_s28] sm:$0xff] %v1028_v11  ;;  %v1559_v13 = vpop.f32.mrb[2].mxu0 }
 0x2c4   : > { %1171 = vst [vmem:[%s2411_s28 + $0x80] sm:$0xff] %v1092_v12  ;;  %v1575_v14 = vpop.f32.mrb[2].mxu1  ;;  %1158 = vst [vmem:[%s2411_s28 + $0x18] sm:$0xff] %v1559_v13  ;;  %v1031_v15 = vpop.f32.mrb[3].mxu0 }
 0x2c5   : > { %1174 = vst [vmem:[%s2411_s28 + $0x98] sm:$0xff] %v1575_v14  ;;  %v1095_v16 = vpop.f32.mrb[3].mxu1  ;;  %1156 = vst [vmem:[%s2411_s28 + $0x8] sm:$0xff] %v1031_v15 }
 0x2c6   : > { %1172 = vst [vmem:[%s2411_s28 + $0x88] sm:$0xff] %v1095_v16 }
 0x2c9   : > { %v1562_v17 = vpop.f32.mrb[4].mxu0 }
 0x2ca   : > { %v1578_v18 = vpop.f32.mrb[4].mxu1  ;;  %1161 = vst [vmem:[%s2411_s28 + $0x30] sm:$0xff] %v1562_v17  ;;  %v1044_v19 = vpop.f32.mrb[5].mxu0 }
 0x2cb   : > { %1177 = vst [vmem:[%s2411_s28 + $0xb0] sm:$0xff] %v1578_v18  ;;  %v1108_v20 = vpop.f32.mrb[5].mxu1  ;;  %1159 = vst [vmem:[%s2411_s28 + $0x20] sm:$0xff] %v1044_v19  ;;  %v1563_v21 = vpop.f32.mrb[6].mxu0 }
 0x2cc   : > { %1175 = vst [vmem:[%s2411_s28 + $0xa0] sm:$0xff] %v1108_v20  ;;  %v1579_v22 = vpop.f32.mrb[6].mxu1  ;;  %1162 = vst [vmem:[%s2411_s28 + $0x38] sm:$0xff] %v1563_v21  ;;  %v1047_v23 = vpop.f32.mrb[7].mxu0 }
 0x2cd   : > { %1178 = vst [vmem:[%s2411_s28 + $0xb8] sm:$0xff] %v1579_v22  ;;  %v1111_v24 = vpop.f32.mrb[7].mxu1  ;;  %1160 = vst [vmem:[%s2411_s28 + $0x28] sm:$0xff] %v1047_v23 }
 0x2ce   : > { %1176 = vst [vmem:[%s2411_s28 + $0xa8] sm:$0xff] %v1111_v24 }
 0x2d1   : > { %v1566_v25 = vpop.f32.mrb[8].mxu0 }
 0x2d2   : > { %v1582_v26 = vpop.f32.mrb[8].mxu1  ;;  %1165 = vst [vmem:[%s2411_s28 + $0x50] sm:$0xff] %v1566_v25  ;;  %v1060_v27 = vpop.f32.mrb[9].mxu0 }
 0x2d3   : > { %1181 = vst [vmem:[%s2411_s28 + $0xd0] sm:$0xff] %v1582_v26  ;;  %v1124_v28 = vpop.f32.mrb[9].mxu1  ;;  %1163 = vst [vmem:[%s2411_s28 + $0x40] sm:$0xff] %v1060_v27  ;;  %v1567_v29 = vpop.f32.mrb[10].mxu0 }
 0x2d4   : > { %1179 = vst [vmem:[%s2411_s28 + $0xc0] sm:$0xff] %v1124_v28  ;;  %v1583_v30 = vpop.f32.mrb[10].mxu1  ;;  %1166 = vst [vmem:[%s2411_s28 + $0x58] sm:$0xff] %v1567_v29  ;;  %v1063_v31 = vpop.f32.mrb[11].mxu0 }
 0x2d5   : > { %1182 = vst [vmem:[%s2411_s28 + $0xd8] sm:$0xff] %v1583_v30  ;;  %v1127_v32 = vpop.f32.mrb[11].mxu1  ;;  %1164 = vst [vmem:[%s2411_s28 + $0x48] sm:$0xff] %v1063_v31 }
 0x2d6   : > { %1180 = vst [vmem:[%s2411_s28 + $0xc8] sm:$0xff] %v1127_v32 }
 0x2d9   : > { %v1570_v33 = vpop.f32.mrb[12].mxu0 }
 0x2da   : > { %v1586_v34 = vpop.f32.mrb[12].mxu1  ;;  %1169 = vst [vmem:[%s2411_s28 + $0x70] sm:$0xff] %v1570_v33  ;;  %v1076_v35 = vpop.f32.mrb[13].mxu0 }
 0x2db   : > { %1185 = vst [vmem:[%s2411_s28 + $0xf0] sm:$0xff] %v1586_v34  ;;  %v1140_v36 = vpop.f32.mrb[13].mxu1  ;;  %1167 = vst [vmem:[%s2411_s28 + $0x60] sm:$0xff] %v1076_v35  ;;  %v1571_v37 = vpop.f32.mrb[14].mxu0 }
 0x2dc   : > { %1183 = vst [vmem:[%s2411_s28 + $0xe0] sm:$0xff] %v1140_v36  ;;  %v1587_v38 = vpop.f32.mrb[14].mxu1  ;;  %1170 = vst [vmem:[%s2411_s28 + $0x78] sm:$0xff] %v1571_v37  ;;  %v1079_v39 = vpop.f32.mrb[15].mxu0 }
 0x2dd   : > { %1186 = vst [vmem:[%s2411_s28 + $0xf8] sm:$0xff] %v1587_v38  ;;  %v1143_v40 = vpop.f32.mrb[15].mxu1  ;;  %1168 = vst [vmem:[%s2411_s28 + $0x68] sm:$0xff] %v1079_v39 }
 0x2de   : > { %1184 = vst [vmem:[%s2411_s28 + $0xe8] sm:$0xff] %v1143_v40 }
 0x2df PF: > { %s2645_s21 = sld [smem:[#allocation17_spill]]  ;;  %s2647_s5 = sld [smem:[#allocation20_spill]] }
 0x2e0   : > { %s2648_s26 = sld [smem:[#allocation25_spill]]  ;;  %s1201_s7 = sshll.u32 %s2411_s28, 4  ;;  %s2502_s7 = int_to_ptr.vmem [resolvable:$true] %s1201_s7 }
 0x2e1   : > { %s2506_s18 = scalar_lea.sflag [#allocation5], %s257_s13  ;;  %s1930_s6 = scalar_lea.vmem %s2502_s7, 4096 }
 0x2e2   : > { %p1931_p2 = scmp.ne.s32.totalorder %s2502_s7, %s1930_s6  ;;  %s2095_s2 = smov [#allocation9]  }
 0x2e3   : > { %s1934_s29 = sshll.u32 %s2095_s2, 4  ;;  %s1935_s29 = int_to_ptr.vmem [resolvable:$false] %s1934_s29 }
 0x2e4   : > { %s1936_s10 = scalar_lea.vmem %s1935_s29, 8192  ;;  %p1937_p4 = scmp.lt.s32.totalorder %s2502_s7, %s1935_s29 }
 0x2e5   : > { %s1403_s11 = sshll.u32 %s2645_s21, 12  ;;  %p2649_p10 = scmp.ne.s32.totalorder %s2647_s5, 0 }
 0x2e6   : > { %s2499_s4 = scalar_lea.hbm %s2648_s26, %s1403_s11  ;;  %p1938_p8 = scmp.lt.s32.totalorder %s1936_s10, %s1930_s6 }
 0x2e7   : > { %p1932_p7 = pnand %p1931_p2, %p2649_p10 }
 0x2e8   : > { %p1939_p12 = por %p1938_p8, %p1937_p4 }
 0x2e9   : > { %p1933_p11 = pneg %p1932_p7 }
 0x2eb   : > { %p1940_p13 = pnand %p1939_p12, %p1933_p11 }
 0x2ed   : > { %1943 = shalt.err (!%p1940_p13)
}
 0x2ee   : > { %s1944_s13 = scalar_lea.hbm %s2499_s4, 4096  ;;  %s1948_s8 = scalar_lea.hbm %s2648_s26, 8192 }
 0x2ef   : > { %p1945_p6 = scmp.ne.s32.totalorder %s2499_s4, %s1944_s13  ;;  %p1949_p3 = scmp.lt.u32.totalorder %s2499_s4, %s2648_s26 }
 0x2f0   : > { %p1950_p9 = scmp.lt.u32.totalorder %s1948_s8, %s1944_s13  ;;  %p1952_p2 = scmp.lt.u32.totalorder %s1944_s13, %s2499_s4 }
 0x2f1   : > { %p1946_p0 = pnand %p1945_p6, %p2649_p10 }
 0x2f2   : > { %p1951_p5 = por %p1950_p9, %p1949_p3 }
 0x2f3   : > { %p1947_p1 = pneg %p1946_p0 }
 0x2f4   : > { %p1953_p7 = por %p1952_p2, %p1951_p5 }
 0x2f6   : > { %p1954_p11 = pnand %p1953_p7, %p1947_p1 }
 0x2f8   : > { %1957 = shalt.err (!%p1954_p11)
}
 0x2f9   : > { %s2096_s11 = smov 128   ;;  %s2097_s22 = smov 8  }
 0x2fa   : > { %1628 = dma.vmem_to_hbm [thread:$0]  (%p2649_p10), %s2502_s7, 4096, %s2499_s4, %s2506_s18, %s2096_s11, %s2096_s11, %s2097_s22  }
 0x2fb PF: > { %s2650_s9 = sld [smem:[#allocation14_spill]]  ;;  %s2651_s6 = sld [smem:[#allocation21_spill]] }
 0x2fc   : > { %p1648_p4 = scmp.ge.s32.totalorder %s2084_s25, 2 }
 0x301   : > { %s1216_s2 = sand.u32 1, %s2650_s9   ;;  %p2652_p8 = scmp.ne.s32.totalorder %s2651_s6, 0 }
 0x302   : > { %s1217_s29 = scalar_lea.sflag [#allocation5], %s1216_s2 }
 0x303   : > { %p1642_p12 = pnand %p1648_p4, %p2652_p8 }
 0x305   : > { %2027 = dma.done.wait (!%p1642_p12), %s1217_s29, 4096  }
 0x306   : > { %2029 = vsyncadd (!%p1642_p12), %s1217_s29, 4294963200  ;;  %s22_s25 = sadd.s32 1, %s2084_s25   ;;  %s2654_s13 = sld [smem:[#allocation15_spill]] }
 0x307   : > { %p2535_p13 = scmp.ge.s32.totalorder %s22_s25, 6   ;;  %s2655_s5 = smov %s2284_s12 }
 0x308   : > { %s2656_s4 = sld [smem:[#allocation22_spill]]  ;;  %s2657_s7 = sld [smem:[#allocation23_spill]] }
 0x309   : > { %s2664_s18 = smov %s2060_s19  ;;  %s2665_s19 = smov %s2064_s20 }
 0x30a   : > { %s2666_s20 = smov %s2655_s5  ;;  %s2667_s21 = smov %s2076_s23 }
 0x30b   : > { %s2668_s22 = smov %s2080_s24  ;;  %21 = sbr.rel (!%p2535_p13) target bundleno = 15 (0xf), region = 102 }
 0x30c   : > { %s2658_s12 = smov %s2654_s13  ;;  %s2659_s13 = smov %s2040_s14 }
 0x30d   : > { %s2660_s14 = smov %s2281_s15  ;;  %s2661_s15 = smov %s2048_s16 }
 0x30e   : > { %s2662_s16 = smov %s2052_s17  ;;  %s2663_s17 = smov %s2337_s30 }
 0x30f   : > { %s2669_s23 = smov %s2656_s4  ;;  %s2670_s24 = smov %s2657_s7 }
 0x312   :  { %1222 = vsyncpa [#allocation4], 1 }
 0x313   :  { %1224 = vsyncpa [#allocation4 + $0x1], 1 }
 0x314   :  { %1225 = vsyncpa [#allocation7], 1 }
 0x315   :  { %1227 = vsyncpa [#allocation7 + $0x1], 1 }
 0x316   :  { %1228 = vsyncpa [#allocation5], 1 }
 0x317   :  { %1230 = vsyncpa [#allocation5 + $0x1], 1 }

</bundles_post_ra>
